<compile_context>
chip_gen: v5e
topology: v5e:2x2
jax: 0.10.0
libtpu: 0.0.40
codegen_flags: <defaults>
</compile_context>

<pallas_src>
import functools
import math

import jax
import jax.numpy as jnp
from jax.experimental import pallas as pl
from jax.experimental.pallas import tpu as pltpu

_VMEM_LIMIT = 32 * 1024 * 1024  # safe on v5e/v6e/v7x, 2x the v5e scoped default


# ----------------------------------------------------------------------------
# Tile-size helpers (largest candidate that evenly divides, else full extent)
# ----------------------------------------------------------------------------
def _pick_tile(dim, candidates):
    for c in candidates:
        if c <= dim and dim % c == 0:
            return c
    return dim  # full array dim is always a legal block size


_M_TILES = (512, 256, 128, 64, 32, 16)      # rows of x / out   (sublane axis)
_N_TILES = (512, 384, 256, 128)             # out cols, keep 128-multiples
_TQ_TILES = (256, 128, 64, 32, 16)
_TK_TILES = (512, 256, 128, 64, 32, 16)


# ----------------------------------------------------------------------------
# Linear projection kernels:  y = x @ w (+ b)
# ----------------------------------------------------------------------------
def _linear_kernel(x_ref, w_ref, o_ref):
    o_ref[...] = jnp.dot(
        x_ref[...], w_ref[...], preferred_element_type=jnp.float32
    ).astype(o_ref.dtype)


def _linear_bias_kernel(x_ref, w_ref, b_ref, o_ref):
    acc = jnp.dot(x_ref[...], w_ref[...], preferred_element_type=jnp.float32)
    o_ref[...] = (acc + b_ref[...]).astype(o_ref.dtype)


def _linear(x2d, w, b=None, *, out_dtype):
    """x2d: (M, K), w: (K, N) pre-transposed, b: (N,) f32 or None."""
    M, K = x2d.shape
    Kw, N = w.shape
    assert K == Kw
    tm = _pick_tile(M, _M_TILES)
    tn = _pick_tile(N, _N_TILES)
    grid = (M // tm, N // tn)

    x_spec = pl.BlockSpec((tm, K), lambda i, j: (i, 0))
    w_spec = pl.BlockSpec((K, tn), lambda i, j: (0, j))
    o_spec = pl.BlockSpec((tm, tn), lambda i, j: (i, j))

    out_itemsize = jnp.dtype(out_dtype).itemsize
    bytes_accessed = (
        x2d.size * x2d.dtype.itemsize
        + w.size * w.dtype.itemsize
        + (0 if b is None else N * 4)
        + M * N * out_itemsize
    )
    cost = pl.CostEstimate(
        flops=2 * M * K * N, transcendentals=0, bytes_accessed=bytes_accessed
    )
    cparams = pltpu.CompilerParams(
        dimension_semantics=("parallel", "parallel"),
        vmem_limit_bytes=_VMEM_LIMIT,
    )

    if b is None:
        return pl.pallas_call(
            _linear_kernel,
            out_shape=jax.ShapeDtypeStruct((M, N), out_dtype),
            grid_spec=pltpu.PrefetchScalarGridSpec(
                num_scalar_prefetch=0,
                grid=grid,
                in_specs=[x_spec, w_spec],
                out_specs=o_spec,
            ),
            compiler_params=cparams,
            cost_estimate=cost,
        )(x2d, w)

    b2d = b.reshape(1, N).astype(jnp.float32)
    b_spec = pl.BlockSpec((1, tn), lambda i, j: (0, j))
    return pl.pallas_call(
        _linear_bias_kernel,
        out_shape=jax.ShapeDtypeStruct((M, N), out_dtype),
        grid_spec=pltpu.PrefetchScalarGridSpec(
            num_scalar_prefetch=0,
            grid=grid,
            in_specs=[x_spec, w_spec, b_spec],
            out_specs=o_spec,
        ),
        compiler_params=cparams,
        cost_estimate=cost,
    )(x2d, w, b2d)


# ----------------------------------------------------------------------------
# Flash attention kernel (replaces fMHCA):  softmax(scale * q k^T) v per head
# ----------------------------------------------------------------------------
def _flash_attn_kernel(q_ref, k_ref, v_ref, o_ref, m_sc, l_sc, acc_sc, *, scale):
    kv_i = pl.program_id(2)

    @pl.when(kv_i == 0)
    def _():
        m_sc[...] = jnp.full(m_sc.shape, -jnp.inf, jnp.float32)
        l_sc[...] = jnp.zeros(l_sc.shape, jnp.float32)
        acc_sc[...] = jnp.zeros(acc_sc.shape, jnp.float32)

    q = q_ref[0]  # (tq, d)
    k = k_ref[0]  # (tk, d)
    v = v_ref[0]  # (tk, d)

    s = jax.lax.dot_general(
        q, k, (((1,), (1,)), ((), ())), preferred_element_type=jnp.float32
    ) * scale                                            # (tq, tk) f32

    m_prev = m_sc[...]
    m_new = jnp.maximum(m_prev, s.max(axis=-1, keepdims=True))
    alpha = jnp.exp(m_prev - m_new)
    p = jnp.exp(s - m_new)
    l_sc[...] = alpha * l_sc[...] + p.sum(axis=-1, keepdims=True)
    acc_sc[...] = alpha * acc_sc[...] + jnp.dot(
        p.astype(v.dtype), v, preferred_element_type=jnp.float32
    )
    m_sc[...] = m_new

    @pl.when(kv_i == pl.num_programs(2) - 1)
    def _():
        o_ref[0] = (
            acc_sc[...] * pl.reciprocal(l_sc[...], approx=True)
        ).astype(o_ref.dtype)


def _mh_attention(q, k, v, *, scale):
    """q: (BH, Nq, d), k/v: (BH, Nkv, d)  ->  (BH, Nq, d)."""
    BH, Nq, d = q.shape
    _, Nkv, _ = k.shape
    tq = _pick_tile(Nq, _TQ_TILES)
    tk = _pick_tile(Nkv, _TK_TILES)
    grid = (BH, Nq // tq, Nkv // tk)

    itemsize = q.dtype.itemsize
    cost = pl.CostEstimate(
        flops=4 * BH * Nq * Nkv * d,
        transcendentals=BH * Nq * Nkv,
        bytes_accessed=(q.size + k.size + v.size + q.size) * itemsize,
    )

    return pl.pallas_call(
        functools.partial(_flash_attn_kernel, scale=scale),
        out_shape=jax.ShapeDtypeStruct((BH, Nq, d), q.dtype),
        grid_spec=pltpu.PrefetchScalarGridSpec(
            num_scalar_prefetch=0,
            grid=grid,
            in_specs=[
                pl.BlockSpec((1, tq, d), lambda b, i, j: (b, i, 0)),
                pl.BlockSpec((1, tk, d), lambda b, i, j: (b, j, 0)),
                pl.BlockSpec((1, tk, d), lambda b, i, j: (b, j, 0)),
            ],
            out_specs=pl.BlockSpec((1, tq, d), lambda b, i, j: (b, i, 0)),
            scratch_shapes=[
                pltpu.VMEM((tq, 1), jnp.float32),
                pltpu.VMEM((tq, 1), jnp.float32),
                pltpu.VMEM((tq, d), jnp.float32),
            ],
        ),
        compiler_params=pltpu.CompilerParams(
            dimension_semantics=("parallel", "parallel", "arbitrary"),
            vmem_limit_bytes=_VMEM_LIMIT,
        ),
        cost_estimate=cost,
    )(q, k, v)


# ----------------------------------------------------------------------------
# Module forward
# ----------------------------------------------------------------------------
def prepare_params(wq, wk, wv, wo, bo, *, compute_dtype=jnp.bfloat16):
    """Hoisted once-per-model glue: transpose PyTorch (out,in) weights to
    (in,out) and cast to the MXU compute dtype; keep the bias in f32."""
    return dict(
        wq_t=jnp.asarray(wq).T.astype(compute_dtype),
        wk_t=jnp.asarray(wk).T.astype(compute_dtype),
        wv_t=jnp.asarray(wv).T.astype(compute_dtype),
        wo_t=jnp.asarray(wo).T.astype(compute_dtype),
        bo=jnp.asarray(bo).astype(jnp.float32),
    )


def ldm_cross_attn(x, context, params, *, heads, dim_head):
    """x: (B, Nq, query_dim); context: (B, Nkv, context_dim) or None."""
    if context is None:
        context = x
    B, Nq, qdim = x.shape
    _, Nkv, cdim = context.shape
    inner = heads * dim_head
    scale = float(dim_head) ** -0.5
    compute_dtype = params["wq_t"].dtype

    x2d = x.reshape(B * Nq, qdim).astype(compute_dtype)
    c2d = context.reshape(B * Nkv, cdim).astype(compute_dtype)

    q = _linear(x2d, params["wq_t"], out_dtype=compute_dtype)   # (B*Nq, inner)
    k = _linear(c2d, params["wk_t"], out_dtype=compute_dtype)   # (B*Nkv, inner)
    v = _linear(c2d, params["wv_t"], out_dtype=compute_dtype)   # (B*Nkv, inner)

    def split_heads(t, n):
        t = t.reshape(B, n, heads, dim_head)
        t = jnp.transpose(t, (0, 2, 1, 3))
        return t.reshape(B * heads, n, dim_head)

    qh = split_heads(q, Nq)
    kh = split_heads(k, Nkv)
    vh = split_heads(v, Nkv)

    oh = _mh_attention(qh, kh, vh, scale=scale)                 # (B*heads, Nq, d)

    o = oh.reshape(B, heads, Nq, dim_head)
    o = jnp.transpose(o, (0, 2, 1, 3)).reshape(B * Nq, inner).astype(compute_dtype)

    out = _linear(o, params["wo_t"], params["bo"], out_dtype=x.dtype)
    return out.reshape(B, Nq, qdim)


# ----------------------------------------------------------------------------
# Pure-JAX reference (transcription of the PyTorch forward)
# ----------------------------------------------------------------------------
def _reference(x, context, wq, wk, wv, wo, bo, *, heads, dim_head):
    if context is None:
        context = x
    B, Nq, _ = x.shape
    _, Nkv, _ = context.shape
    scale = float(dim_head) ** -0.5
    q = x @ wq.T
    k = context @ wk.T
    v = context @ wv.T

    def split(t, n):
        return jnp.transpose(t.reshape(B, n, heads, dim_head), (0, 2, 1, 3))

    qh, kh, vh = split(q, Nq), split(k, Nkv), split(v, Nkv)
    s = jnp.einsum("bhqd,bhkd->bhqk", qh, kh) * scale
    p = jax.nn.softmax(s, axis=-1)
    oh = jnp.einsum("bhqk,bhkd->bhqd", p, vh)
    o = jnp.transpose(oh, (0, 2, 1, 3)).reshape(B, Nq, heads * dim_head)
    return o @ wo.T + bo


if __name__ == "__main__":
    B, heads, dim_head = 2, 4, 8
    query_dim, context_dim = 32, 48
    seq_q, seq_kv = 16, 8
    inner = heads * dim_head

    key = jax.random.PRNGKey(0)
    kx, kc, k1, k2, k3, k4, k5, k6, k7 = jax.random.split(key, 9)

    x = jax.random.normal(kx, (B, seq_q, query_dim), dtype=jnp.float32)
    context = jax.random.normal(kc, (B, seq_kv, context_dim), dtype=jnp.float32)

    def init_w(kk, out_f, in_f):
        bound = 1.0 / math.sqrt(in_f)
        return jax.random.uniform(kk, (out_f, in_f), jnp.float32, -bound, bound)

    wq = init_w(k1, inner, query_dim)
    wk = init_w(k2, inner, context_dim)
    wv = init_w(k3, inner, context_dim)
    wo = init_w(k4, query_dim, inner)
    bo = jax.random.uniform(k5, (query_dim,), jnp.float32, -0.1, 0.1)

    params = prepare_params(wq, wk, wv, wo, bo)
    fwd = jax.jit(functools.partial(ldm_cross_attn, heads=heads, dim_head=dim_head))

    # --- cross-attention path (explicit context) ---
    out = jax.block_until_ready(fwd(x, context, params))
    ref = _reference(x, context, wq, wk, wv, wo, bo, heads=heads, dim_head=dim_head)
    assert out.shape == (B, seq_q, query_dim), out.shape
    assert jnp.allclose(out, ref, atol=2e-2, rtol=2e-2), (
        "cross-attn mismatch, max abs err=%f" % float(jnp.max(jnp.abs(out - ref))))

    # --- self-attention path (context=None; requires context_dim == query_dim) ---
    wk_s = init_w(k6, inner, query_dim)
    wv_s = init_w(k7, inner, query_dim)
    params_self = prepare_params(wq, wk_s, wv_s, wo, bo)
    out_s = jax.block_until_ready(fwd(x, None, params_self))
    ref_s = _reference(x, None, wq, wk_s, wv_s, wo, bo, heads=heads, dim_head=dim_head)
    assert jnp.allclose(out_s, ref_s, atol=2e-2, rtol=2e-2), (
        "self-attn mismatch, max abs err=%f" % float(jnp.max(jnp.abs(out_s - ref_s))))

    print("KERNEL_OK")
</pallas_src>

<mosaic_0001>
module attributes {stable_mosaic.version = 11 : i64} {
  func.func @_linear_kernel(%arg0: i32, %arg1: i32, %arg2: memref<32x32xbf16, #tpu.memory_space<vmem>>, %arg3: memref<32x32xbf16, #tpu.memory_space<vmem>>, %arg4: memref<32x32xbf16, #tpu.memory_space<vmem>>) attributes {dimension_semantics = [#tpu.dimension_semantics<parallel>, #tpu.dimension_semantics<parallel>], iteration_bounds = array<i64: 1, 1>, scalar_prefetch = 0 : i64, scratch_operands = 0 : i64, tpu.core_type = #tpu.core_type<tc>, window_params = [{transform_indices = @transform_0, window_bounds = array<i64: 32, 32>}, {transform_indices = @transform_1, window_bounds = array<i64: 32, 32>}, {transform_indices = @transform_2, window_bounds = array<i64: 32, 32>}]} {
    %c0 = arith.constant 0 : index
    %c0_0 = arith.constant 0 : index
    %0 = vector.load %arg2[%c0, %c0_0] : memref<32x32xbf16, #tpu.memory_space<vmem>>, vector<32x32xbf16>
    %c0_1 = arith.constant 0 : index
    %c0_2 = arith.constant 0 : index
    %1 = vector.load %arg3[%c0_1, %c0_2] : memref<32x32xbf16, #tpu.memory_space<vmem>>, vector<32x32xbf16>
    %cst = arith.constant dense<0.000000e+00> : vector<32x32xf32>
    %2 = tpu.matmul %0, %1, %cst {dimension_numbers = #tpu.dot_dimension_numbers<[1], [0], [0], [1], [0, 0, 1, 1], [], []>} : vector<32x32xbf16>, vector<32x32xbf16>, vector<32x32xf32> -> vector<32x32xf32>
    %3 = arith.truncf %2 : vector<32x32xf32> to vector<32x32xbf16>
    %c0_3 = arith.constant 0 : index
    %c0_4 = arith.constant 0 : index
    %4 = vector.load %arg4[%c0_3, %c0_4] : memref<32x32xbf16, #tpu.memory_space<vmem>>, vector<32x32xbf16>
    tpu.vector_store %arg4[%c0_3, %c0_4], %3 {strides = array<i32>} : memref<32x32xbf16, #tpu.memory_space<vmem>>, vector<32x32xbf16>,
    return
  }
  func.func @transform_0(%arg0: i32, %arg1: i32) -> (i32, i32) {
    %c0_i32 = arith.constant 0 : i32
    %c0_i32_0 = arith.constant 0 : i32
    return %arg0, %c0_i32 : i32, i32
  }
  func.func @transform_1(%arg0: i32, %arg1: i32) -> (i32, i32) {
    %c0_i32 = arith.constant 0 : i32
    %c0_i32_0 = arith.constant 0 : i32
    return %c0_i32, %arg1 : i32, i32
  }
  func.func @transform_2(%arg0: i32, %arg1: i32) -> (i32, i32) {
    %c0_i32 = arith.constant 0 : i32
    return %arg0, %arg1 : i32, i32
  }
}

module attributes {stable_mosaic.version = 11 : i64} {
  func.func @_linear_kernel(%arg0: i32, %arg1: i32, %arg2: memref<16x48xbf16, #tpu.memory_space<vmem>>, %arg3: memref<48x32xbf16, #tpu.memory_space<vmem>>, %arg4: memref<16x32xbf16, #tpu.memory_space<vmem>>) attributes {dimension_semantics = [#tpu.dimension_semantics<parallel>, #tpu.dimension_semantics<parallel>], iteration_bounds = array<i64: 1, 1>, scalar_prefetch = 0 : i64, scratch_operands = 0 : i64, tpu.core_type = #tpu.core_type<tc>, window_params = [{transform_indices = @transform_0, window_bounds = array<i64: 16, 48>}, {transform_indices = @transform_1, window_bounds = array<i64: 48, 32>}, {transform_indices = @transform_2, window_bounds = array<i64: 16, 32>}]} {
    %c0 = arith.constant 0 : index
    %c0_0 = arith.constant 0 : index
    %0 = vector.load %arg2[%c0, %c0_0] : memref<16x48xbf16, #tpu.memory_space<vmem>>, vector<16x48xbf16>
    %c0_1 = arith.constant 0 : index
    %c0_2 = arith.constant 0 : index
    %1 = vector.load %arg3[%c0_1, %c0_2] : memref<48x32xbf16, #tpu.memory_space<vmem>>, vector<48x32xbf16>
    %cst = arith.constant dense<0.000000e+00> : vector<16x32xf32>
    %2 = tpu.matmul %0, %1, %cst {dimension_numbers = #tpu.dot_dimension_numbers<[1], [0], [0], [1], [0, 0, 1, 1], [], []>} : vector<16x48xbf16>, vector<48x32xbf16>, vector<16x32xf32> -> vector<16x32xf32>
    %3 = arith.truncf %2 : vector<16x32xf32> to vector<16x32xbf16>
    %c0_3 = arith.constant 0 : index
    %c0_4 = arith.constant 0 : index
    %4 = vector.load %arg4[%c0_3, %c0_4] : memref<16x32xbf16, #tpu.memory_space<vmem>>, vector<16x32xbf16>
    tpu.vector_store %arg4[%c0_3, %c0_4], %3 {strides = array<i32>} : memref<16x32xbf16, #tpu.memory_space<vmem>>, vector<16x32xbf16>,
    return
  }
  func.func @transform_0(%arg0: i32, %arg1: i32) -> (i32, i32) {
    %c0_i32 = arith.constant 0 : i32
    %c0_i32_0 = arith.constant 0 : i32
    return %arg0, %c0_i32 : i32, i32
  }
  func.func @transform_1(%arg0: i32, %arg1: i32) -> (i32, i32) {
    %c0_i32 = arith.constant 0 : i32
    %c0_i32_0 = arith.constant 0 : i32
    return %c0_i32, %arg1 : i32, i32
  }
  func.func @transform_2(%arg0: i32, %arg1: i32) -> (i32, i32) {
    %c0_i32 = arith.constant 0 : i32
    return %arg0, %arg1 : i32, i32
  }
}

module attributes {stable_mosaic.version = 11 : i64} {
  func.func @_flash_attn_kernel(%arg0: i32, %arg1: i32, %arg2: i32, %arg3: memref<1x16x8xbf16, #tpu.memory_space<vmem>>, %arg4: memref<1x8x8xbf16, #tpu.memory_space<vmem>>, %arg5: memref<1x8x8xbf16, #tpu.memory_space<vmem>>, %arg6: memref<1x16x8xbf16, #tpu.memory_space<vmem>>, %arg7: memref<16x1xf32, #tpu.memory_space<vmem>>, %arg8: memref<16x1xf32, #tpu.memory_space<vmem>>, %arg9: memref<16x8xf32, #tpu.memory_space<vmem>>) attributes {dimension_semantics = [#tpu.dimension_semantics<parallel>, #tpu.dimension_semantics<parallel>, #tpu.dimension_semantics<arbitrary>], iteration_bounds = array<i64: 8, 1, 1>, scalar_prefetch = 0 : i64, scratch_operands = 3 : i64, tpu.core_type = #tpu.core_type<tc>, window_params = [{transform_indices = @transform_0, window_bounds = array<i64: 1, 16, 8>}, {transform_indices = @transform_1, window_bounds = array<i64: 1, 8, 8>}, {transform_indices = @transform_2, window_bounds = array<i64: 1, 8, 8>}, {transform_indices = @transform_3, window_bounds = array<i64: 1, 16, 8>}]} {
    %c0_i32 = arith.constant 0 : i32
    %0 = arith.cmpi eq, %arg2, %c0_i32 : i32
    %1 = arith.extui %0 : i1 to i32
    %c0_i32_0 = arith.constant 0 : i32
    %2 = arith.cmpi ne, %1, %c0_i32_0 : i32
    scf.if %2 {
      %cst_27 = arith.constant 0xFF800000 : f32
      %38 = vector.broadcast %cst_27 : f32 to vector<16x1xf32>
      %c0_28 = arith.constant 0 : index
      %c0_29 = arith.constant 0 : index
      %39 = vector.load %arg7[%c0_28, %c0_29] : memref<16x1xf32, #tpu.memory_space<vmem>>, vector<16x1xf32>
      tpu.vector_store %arg7[%c0_28, %c0_29], %38 {strides = array<i32>} : memref<16x1xf32, #tpu.memory_space<vmem>>, vector<16x1xf32>,
      %cst_30 = arith.constant 0.000000e+00 : f32
      %40 = vector.broadcast %cst_30 : f32 to vector<16x1xf32>
      %c0_31 = arith.constant 0 : index
      %c0_32 = arith.constant 0 : index
      %41 = vector.load %arg8[%c0_31, %c0_32] : memref<16x1xf32, #tpu.memory_space<vmem>>, vector<16x1xf32>
      tpu.vector_store %arg8[%c0_31, %c0_32], %40 {strides = array<i32>} : memref<16x1xf32, #tpu.memory_space<vmem>>, vector<16x1xf32>,
      %cst_33 = arith.constant 0.000000e+00 : f32
      %42 = vector.broadcast %cst_33 : f32 to vector<16x8xf32>
      %c0_34 = arith.constant 0 : index
      %c0_35 = arith.constant 0 : index
      %43 = vector.load %arg9[%c0_34, %c0_35] : memref<16x8xf32, #tpu.memory_space<vmem>>, vector<16x8xf32>
      tpu.vector_store %arg9[%c0_34, %c0_35], %42 {strides = array<i32>} : memref<16x8xf32, #tpu.memory_space<vmem>>, vector<16x8xf32>,
    } else {
    }
    %c0 = arith.constant 0 : index
    %c0_1 = arith.constant 0 : index
    %c0_2 = arith.constant 0 : index
    %3 = vector.load %arg3[%c0, %c0_1, %c0_2] : memref<1x16x8xbf16, #tpu.memory_space<vmem>>, vector<1x16x8xbf16>
    %4 = vector.shape_cast %3 : vector<1x16x8xbf16> to vector<16x8xbf16>
    %c0_3 = arith.constant 0 : index
    %c0_4 = arith.constant 0 : index
    %c0_5 = arith.constant 0 : index
    %5 = vector.load %arg4[%c0_3, %c0_4, %c0_5] : memref<1x8x8xbf16, #tpu.memory_space<vmem>>, vector<1x8x8xbf16>
    %6 = vector.shape_cast %5 : vector<1x8x8xbf16> to vector<8x8xbf16>
    %c0_6 = arith.constant 0 : index
    %c0_7 = arith.constant 0 : index
    %c0_8 = arith.constant 0 : index
    %7 = vector.load %arg5[%c0_6, %c0_7, %c0_8] : memref<1x8x8xbf16, #tpu.memory_space<vmem>>, vector<1x8x8xbf16>
    %8 = vector.shape_cast %7 : vector<1x8x8xbf16> to vector<8x8xbf16>
    %cst = arith.constant dense<0.000000e+00> : vector<16x8xf32>
    %9 = tpu.matmul %4, %6, %cst {dimension_numbers = #tpu.dot_dimension_numbers<[1], [1], [0], [0], [0, 0, 1, 0], [], []>} : vector<16x8xbf16>, vector<8x8xbf16>, vector<16x8xf32> -> vector<16x8xf32>
    %cst_9 = arith.constant 0.353553385 : f32
    %10 = vector.broadcast %cst_9 : f32 to vector<16x8xf32>
    %11 = arith.mulf %9, %10 : vector<16x8xf32>
    %c0_10 = arith.constant 0 : index
    %c0_11 = arith.constant 0 : index
    %12 = vector.load %arg7[%c0_10, %c0_11] : memref<16x1xf32, #tpu.memory_space<vmem>>, vector<16x1xf32>
    %cst_12 = arith.constant dense<0xFF800000> : vector<16xf32>
    %13 = vector.multi_reduction <maximumf>, %11, %cst_12 [1] : vector<16x8xf32> to vector<16xf32>
    %14 = vector.shape_cast %13 : vector<16xf32> to vector<16x1xf32>
    %15 = arith.maximumf %12, %14 : vector<16x1xf32>
    %16 = arith.subf %12, %15 : vector<16x1xf32>
    %17 = math.exp %16 : vector<16x1xf32>
    %18 = vector.broadcast %15 : vector<16x1xf32> to vector<16x8xf32>
    %19 = arith.subf %11, %18 : vector<16x8xf32>
    %20 = math.exp %19 : vector<16x8xf32>
    %c0_13 = arith.constant 0 : index
    %c0_14 = arith.constant 0 : index
    %21 = vector.load %arg8[%c0_13, %c0_14] : memref<16x1xf32, #tpu.memory_space<vmem>>, vector<16x1xf32>
    %22 = arith.mulf %17, %21 : vector<16x1xf32>
    %cst_15 = arith.constant dense<0.000000e+00> : vector<16xf32>
    %23 = vector.multi_reduction <add>, %20, %cst_15 [1] : vector<16x8xf32> to vector<16xf32>
    %24 = vector.shape_cast %23 : vector<16xf32> to vector<16x1xf32>
    %25 = arith.addf %22, %24 : vector<16x1xf32>
    %c0_16 = arith.constant 0 : index
    %c0_17 = arith.constant 0 : index
    %26 = vector.load %arg8[%c0_16, %c0_17] : memref<16x1xf32, #tpu.memory_space<vmem>>, vector<16x1xf32>
    tpu.vector_store %arg8[%c0_16, %c0_17], %25 {strides = array<i32>} : memref<16x1xf32, #tpu.memory_space<vmem>>, vector<16x1xf32>,
    %c0_18 = arith.constant 0 : index
    %c0_19 = arith.constant 0 : index
    %27 = vector.load %arg9[%c0_18, %c0_19] : memref<16x8xf32, #tpu.memory_space<vmem>>, vector<16x8xf32>
    %28 = vector.broadcast %17 : vector<16x1xf32> to vector<16x8xf32>
    %29 = arith.mulf %28, %27 : vector<16x8xf32>
    %30 = arith.truncf %20 : vector<16x8xf32> to vector<16x8xbf16>
    %cst_20 = arith.constant dense<0.000000e+00> : vector<16x8xf32>
    %31 = tpu.matmul %30, %8, %cst_20 {dimension_numbers = #tpu.dot_dimension_numbers<[1], [0], [0], [1], [0, 0, 1, 1], [], []>} : vector<16x8xbf16>, vector<8x8xbf16>, vector<16x8xf32> -> vector<16x8xf32>
    %32 = arith.addf %29, %31 : vector<16x8xf32>
    %c0_21 = arith.constant 0 : index
    %c0_22 = arith.constant 0 : index
    %33 = vector.load %arg9[%c0_21, %c0_22] : memref<16x8xf32, #tpu.memory_space<vmem>>, vector<16x8xf32>
    tpu.vector_store %arg9[%c0_21, %c0_22], %32 {strides = array<i32>} : memref<16x8xf32, #tpu.memory_space<vmem>>, vector<16x8xf32>,
    %c0_23 = arith.constant 0 : index
    %c0_24 = arith.constant 0 : index
    %34 = vector.load %arg7[%c0_23, %c0_24] : memref<16x1xf32, #tpu.memory_space<vmem>>, vector<16x1xf32>
    tpu.vector_store %arg7[%c0_23, %c0_24], %15 {strides = array<i32>} : memref<16x1xf32, #tpu.memory_space<vmem>>, vector<16x1xf32>,
    %c0_i32_25 = arith.constant 0 : i32
    %35 = arith.cmpi eq, %arg2, %c0_i32_25 : i32
    %36 = arith.extui %35 : i1 to i32
    %c0_i32_26 = arith.constant 0 : i32
    %37 = arith.cmpi ne, %36, %c0_i32_26 : i32
    scf.if %37 {
      %c0_27 = arith.constant 0 : index
      %c0_28 = arith.constant 0 : index
      %38 = vector.load %arg9[%c0_27, %c0_28] : memref<16x8xf32, #tpu.memory_space<vmem>>, vector<16x8xf32>
      %c0_29 = arith.constant 0 : index
      %c0_30 = arith.constant 0 : index
      %39 = vector.load %arg8[%c0_29, %c0_30] : memref<16x1xf32, #tpu.memory_space<vmem>>, vector<16x1xf32>
      %40 = tpu.reciprocal %39 {approx = true} : vector<16x1xf32> -> vector<16x1xf32>
      %41 = vector.broadcast %40 : vector<16x1xf32> to vector<16x8xf32>
      %42 = arith.mulf %38, %41 : vector<16x8xf32>
      %43 = arith.truncf %42 : vector<16x8xf32> to vector<16x8xbf16>
      %c0_31 = arith.constant 0 : index
      %c0_32 = arith.constant 0 : index
      %c0_33 = arith.constant 0 : index
      %44 = vector.load %arg6[%c0_31, %c0_32, %c0_33] : memref<1x16x8xbf16, #tpu.memory_space<vmem>>, vector<1x16x8xbf16>
      %45 = vector.shape_cast %44 : vector<1x16x8xbf16> to vector<16x8xbf16>
      %46 = vector.shape_cast %43 : vector<16x8xbf16> to vector<1x16x8xbf16>
      tpu.vector_store %arg6[%c0_31, %c0_32, %c0_33], %46 {strides = array<i32>} : memref<1x16x8xbf16, #tpu.memory_space<vmem>>, vector<1x16x8xbf16>,
    } else {
    }
    return
  }
  func.func @transform_0(%arg0: i32, %arg1: i32, %arg2: i32) -> (i32, i32, i32) {
    %c0_i32 = arith.constant 0 : i32
    %c0_i32_0 = arith.constant 0 : i32
    return %arg0, %arg1, %c0_i32 : i32, i32, i32
  }
  func.func @transform_1(%arg0: i32, %arg1: i32, %arg2: i32) -> (i32, i32, i32) {
    %c0_i32 = arith.constant 0 : i32
    %c0_i32_0 = arith.constant 0 : i32
    return %arg0, %arg2, %c0_i32 : i32, i32, i32
  }
  func.func @transform_2(%arg0: i32, %arg1: i32, %arg2: i32) -> (i32, i32, i32) {
    %c0_i32 = arith.constant 0 : i32
    %c0_i32_0 = arith.constant 0 : i32
    return %arg0, %arg2, %c0_i32 : i32, i32, i32
  }
  func.func @transform_3(%arg0: i32, %arg1: i32, %arg2: i32) -> (i32, i32, i32) {
    %c0_i32 = arith.constant 0 : i32
    %c0_i32_0 = arith.constant 0 : i32
    return %arg0, %arg1, %c0_i32 : i32, i32, i32
  }
}

module attributes {stable_mosaic.version = 11 : i64} {
  func.func @_linear_bias_kernel(%arg0: i32, %arg1: i32, %arg2: memref<32x32xbf16, #tpu.memory_space<vmem>>, %arg3: memref<32x32xbf16, #tpu.memory_space<vmem>>, %arg4: memref<1x32xf32, #tpu.memory_space<vmem>>, %arg5: memref<32x32xf32, #tpu.memory_space<vmem>>) attributes {dimension_semantics = [#tpu.dimension_semantics<parallel>, #tpu.dimension_semantics<parallel>], iteration_bounds = array<i64: 1, 1>, scalar_prefetch = 0 : i64, scratch_operands = 0 : i64, tpu.core_type = #tpu.core_type<tc>, window_params = [{transform_indices = @transform_0, window_bounds = array<i64: 32, 32>}, {transform_indices = @transform_1, window_bounds = array<i64: 32, 32>}, {transform_indices = @transform_2, window_bounds = array<i64: 1, 32>}, {transform_indices = @transform_3, window_bounds = array<i64: 32, 32>}]} {
    %c0 = arith.constant 0 : index
    %c0_0 = arith.constant 0 : index
    %0 = vector.load %arg2[%c0, %c0_0] : memref<32x32xbf16, #tpu.memory_space<vmem>>, vector<32x32xbf16>
    %c0_1 = arith.constant 0 : index
    %c0_2 = arith.constant 0 : index
    %1 = vector.load %arg3[%c0_1, %c0_2] : memref<32x32xbf16, #tpu.memory_space<vmem>>, vector<32x32xbf16>
    %cst = arith.constant dense<0.000000e+00> : vector<32x32xf32>
    %2 = tpu.matmul %0, %1, %cst {dimension_numbers = #tpu.dot_dimension_numbers<[1], [0], [0], [1], [0, 0, 1, 1], [], []>} : vector<32x32xbf16>, vector<32x32xbf16>, vector<32x32xf32> -> vector<32x32xf32>
    %c0_3 = arith.constant 0 : index
    %c0_4 = arith.constant 0 : index
    %3 = vector.load %arg4[%c0_3, %c0_4] : memref<1x32xf32, #tpu.memory_space<vmem>>, vector<1x32xf32>
    %4 = vector.broadcast %3 : vector<1x32xf32> to vector<32x32xf32>
    %5 = arith.addf %2, %4 : vector<32x32xf32>
    %c0_5 = arith.constant 0 : index
    %c0_6 = arith.constant 0 : index
    %6 = vector.load %arg5[%c0_5, %c0_6] : memref<32x32xf32, #tpu.memory_space<vmem>>, vector<32x32xf32>
    tpu.vector_store %arg5[%c0_5, %c0_6], %5 {strides = array<i32>} : memref<32x32xf32, #tpu.memory_space<vmem>>, vector<32x32xf32>,
    return
  }
  func.func @transform_0(%arg0: i32, %arg1: i32) -> (i32, i32) {
    %c0_i32 = arith.constant 0 : i32
    %c0_i32_0 = arith.constant 0 : i32
    return %arg0, %c0_i32 : i32, i32
  }
  func.func @transform_1(%arg0: i32, %arg1: i32) -> (i32, i32) {
    %c0_i32 = arith.constant 0 : i32
    %c0_i32_0 = arith.constant 0 : i32
    return %c0_i32, %arg1 : i32, i32
  }
  func.func @transform_2(%arg0: i32, %arg1: i32) -> (i32, i32) {
    %c0_i32 = arith.constant 0 : i32
    %c0_i32_0 = arith.constant 0 : i32
    return %c0_i32, %arg1 : i32, i32
  }
  func.func @transform_3(%arg0: i32, %arg1: i32) -> (i32, i32) {
    %c0_i32 = arith.constant 0 : i32
    return %arg0, %arg1 : i32, i32
  }
}

</mosaic_0001>

<bundles_post_ra>
// kernel: ldm_cross_attn.5
= control target key start
LH: loop header
LB: loop body
LE: loop exit
PB: predicated region body
PF: predicated region fallthrough
CT: control target
= control target key end

     0   :  { %vm42_vm0 = vcmask 261120   ;;  %vm72_vm1 = vcmask 257024   ;;  %s144_s1 = inlined_call_operand.vmem [shape: bf16[32,32], index: 1, kind: input, shape index: {}]   ;;  %s145_s0 = inlined_call_operand.vmem [shape: bf16[32,32], index: 0, kind: input, shape index: {}]   ;;  %s146_s2 = inlined_call_operand.vmem [shape: bf16[32,32], index: 2, kind: output, shape index: {}]  }
   0x1   :  { %v102_v0 = vld [vmem:[%s144_s1 + $0x8] sm:$0xff]  ;;  %v101_v1 = vld [vmem:[%s144_s1] sm:$0xff] }
   0x2   :  { %55 = vmatpush.bf16.msra.mxu0 %v102_v0  ;;  %103 = vmatpush.bf16.msra.mxu1 %v102_v0  ;;  %v99_v2 = vld [vmem:[%s145_s0] sm:$0xff]  ;;  %v100_v3 = vld [vmem:[%s145_s0 + $0x8] sm:$0xff] }
   0x6   :  { %56 = vmatpush.bf16.msra.mxu0 %v101_v1  ;;  %104 = vmatpush.bf16.msra.mxu1 %v101_v1 }
   0x9   :  { %97 = vmatmul.msk.bf16.vlgmr.msra.gmra.mxu0 %vm42_vm0, %v99_v2  ;;  %98 = vmatmul.msk.bf16.vlgmr.msra.gmra.mxu1 %vm42_vm0, %v100_v3 }
  0x86   :  { %v58_v4 = vpop.f32.mrf.mxu0  ;;  %v63_v5 = vpop.f32.mrf.mxu1 }
  0x87   :  { %v68_v6 = vpack.c.bf16 %v58_v4, %v58_v4  ;;  %v70_v7 = vpack.c.bf16 %v63_v5, %v63_v5 }
  0x89   :  { %73 = vst.msk [vmem:[%s146_s2] sm:$0xf] %vm72_vm1, %v68_v6 }
  0x8a   :  { %75 = vst.msk [vmem:[%s146_s2 + $0x8] sm:$0xf] %vm72_vm1, %v70_v7 }
  0x8e   :  { %v60_v8 = vpop.f32.mrf.mxu0  ;;  %v65_v9 = vpop.f32.mrf.mxu1 }
  0x8f   :  { %v69_v10 = vpack.c.bf16 %v60_v8, %v60_v8  ;;  %v71_v11 = vpack.c.bf16 %v65_v9, %v65_v9 }
  0x91   :  { %74 = vst.msk [vmem:[%s146_s2 + $0x4] sm:$0xf] %vm72_vm1, %v69_v10 }
  0x92   :  { %76 = vst.msk [vmem:[%s146_s2 + $0xc] sm:$0xf] %vm72_vm1, %v71_v11 }

// kernel: ldm_cross_attn.6
= control target key start
LH: loop header
LB: loop body
LE: loop exit
PB: predicated region body
PF: predicated region fallthrough
CT: control target
= control target key end

     0   :  { %vm43_vm0 = vcmask 392192   ;;  %vm63_vm1 = vcmask 257024   ;;  %s124_s1 = inlined_call_operand.vmem [shape: bf16[48,32], index: 1, kind: input, shape index: {}]   ;;  %s125_s0 = inlined_call_operand.vmem [shape: bf16[16,48], index: 0, kind: input, shape index: {}]   ;;  %s126_s2 = inlined_call_operand.vmem [shape: bf16[16,32], index: 2, kind: output, shape index: {}]  }
   0x1   :  { %v90_v0 = vld [vmem:[%s124_s1 + $0x10] sm:$0xff]  ;;  %v89_v1 = vld [vmem:[%s124_s1 + $0x8] sm:$0xff]  ;;  %v88_v2 = vld [vmem:[%s124_s1] sm:$0xff] }
   0x2   :  { %52 = vmatpush.bf16.msra.mxu0 %v90_v0  ;;  %v87_v3 = vld [vmem:[%s125_s0] sm:$0xff] }
   0x6   :  { %53 = vmatpush.bf16.msra.mxu0 %v89_v1 }
   0xa   :  { %54 = vmatpush.bf16.msra.mxu0 %v88_v2 }
   0xd   :  { %86 = vmatmul.msk.bf16.vlgmr.msra.gmra.mxu0 %vm43_vm0, %v87_v3 }
  0x8a   :  { %v56_v4 = vpop.f32.mrf.mxu0 }
  0x8b   :  { %v61_v5 = vpack.c.bf16 %v56_v4, %v56_v4 }
  0x8d   :  { %64 = vst.msk [vmem:[%s126_s2] sm:$0xf] %vm63_vm1, %v61_v5 }
  0x92   :  { %v58_v6 = vpop.f32.mrf.mxu0 }
  0x93   :  { %v62_v7 = vpack.c.bf16 %v58_v6, %v58_v6 }
  0x95   :  { %65 = vst.msk [vmem:[%s126_s2 + $0x4] sm:$0xf] %vm63_vm1, %v62_v7 }

// kernel: ldm_cross_attn.8
= control target key start
LH: loop header
LB: loop body
LE: loop exit
PB: predicated region body
PF: predicated region fallthrough
CT: control target
= control target key end

     0   :  { %s664_s12 = smov 0   ;;  %s666_s13 = smov 0   ;;  %s734_s0 = inlined_call_operand.vmem [shape: bf16[8,16,8], index: 0, kind: input, shape index: {}]   ;;  %s735_s1 = inlined_call_operand.vmem [shape: bf16[8,8,8], index: 1, kind: input, shape index: {}]   ;;  %s736_s2 = inlined_call_operand.vmem [shape: bf16[8,8,8], index: 2, kind: input, shape index: {}]   ;;  %s737_s3 = inlined_call_operand.vmem [shape: bf16[8,16,8], index: 3, kind: output, shape index: {}]  }
   0x1   :  { %s668_s14 = smov 0  }
   0x2 LB: > { %s32_s15 = sadd.s32 1, %s635_s13  ;;  %p557_p0 = scmp.ge.s32.totalorder %s639_s14, 1  ;;  %s639_s14 = sphi %s668_s14, %s13_s14   ;;  %s635_s13 = sphi %s666_s13, %s739_s13   ;;  %s631_s12 = sphi %s664_s12, %s738_s12  }
   0x3   : > { %p34_p1 = scmp.ge.s32.totalorder %s32_s15, 8  ;;  %p193_p2 = scmp.lt.s32.totalorder %s639_s14, 9 }
   0x5   : > { %s741_s15 = smov (%p34_p1, %s32_s15), 0  ;;  %p194_p3 = pnand %p557_p0, %p193_p2 }
   0x6   : > { %p240_p4 = scmp.lt.s32.totalorder (!%p194_p3), %s631_s12, 7 }
   0x7   : > { %197 = sbr.rel (%p194_p3) target bundleno = 659 (0x293), region = 32 }
   0xc   : > { %s743_s12 = smov (!%p240_p4, %s631_s12), 7  ;;  %vm283_vm0 = vcmask 64512   ;;  %vm278_vm1 = vcmask 7168   ;;  %v641_v3 = vmov -inf   ;;  %v642_v10 = vmov 0  }
   0xd   : > { %s560_s16 = sshll.u32 %s743_s12, 2  ;;  %s572_s17 = sshll.u32 %s743_s12, 3  ;;  %279 = vst.msk [vmem:[#allocation2] sm:$0xff] %vm278_vm1, %v641_v3  ;;  %602 = vset.pattern.permute.xlu1 %v642_v10  ;;  %603 = vset.pattern.permute.xlu0 %v642_v10  ;;  %v643_v11 = vmov 0.0   ;;  %vm383_vm2 = vcmask 1043456   ;;  %vm430_vm3 = vcmask 60416  }
   0xe   : > { %s255_s20 = scalar_lea.vmem %s735_s1, %s560_s16  ;;  %s247_s23 = scalar_lea.vmem %s734_s0, %s572_s17  ;;  %280 = vst.msk [vmem:[#allocation2 + $0x8] sm:$0xff] %vm278_vm1, %v641_v3  ;;  %604 = vset.pattern.permute.xlu2 %v642_v10 }
   0xf   : > { %v288_v0 = vld [vmem:[%s255_s20] sm:$0xf]  ;;  %284 = vst.msk [vmem:[#allocation4] sm:$0xff] %vm283_vm0, %v643_v11  ;;  %s262_s26 = scalar_lea.vmem %s736_s2, %s560_s16  ;;  %s271_s29 = scalar_lea.vmem %s737_s3, %s572_s17 }
  0x10   : > { %v300_v1 = vsel %vm283_vm0, %v288_v0, 0  ;;  %v574_v2 = vld [vmem:[%s247_s23] sm:$0xff]  ;;  %281 = vst.msk [vmem:[#allocation3] sm:$0xff] %vm278_vm1, %v643_v11 }
  0x11   : > { %309 = vmatpush.bf16.xpose.msra.mxu0 %v300_v1  ;;  %282 = vst.msk [vmem:[#allocation3 + $0x8] sm:$0xff] %vm278_vm1, %v643_v11  ;;  %v289_v24 = vld [vmem:[%s262_s26] sm:$0xf] }
  0x12   : > { %285 = vst.msk [vmem:[#allocation4 + $0x8] sm:$0xff] %vm283_vm0, %v643_v11  ;;  %v385_v25 = vsel %vm383_vm2, %v289_v24, 0 }
  0x13   : > { %394 = vmatpush.bf16.msra.mxu1 %v385_v25 }
  0x14   : > { %v318_v12 = vld [vmem:[#allocation2] sm:$0xff] }
  0x15   : > { %v319_v17 = vld [vmem:[#allocation2 + $0x8] sm:$0xff] }
  0x16   : > { %v365_v46 = vld [vmem:[#allocation4] sm:$0xff] }
  0x17   : > { %v350_v37 = vld [vmem:[#allocation3] sm:$0xff] }
  0x18   : > { %568 = vmatmul.msk.bf16.vlgmr.msra.gmra.mxu0 %vm283_vm0, %v574_v2  ;;  %v351_v41 = vld [vmem:[#allocation3 + $0x8] sm:$0xff] }
  0x19   : > { %v366_v53 = vld [vmem:[#allocation4 + $0x8] sm:$0xff] }
  0x95   : > { %v311_v4 = vpop.f32.mrf.mxu0 }
  0x96   : > { %v316_v5 = vmul.f32 0.35355338, %v311_v4 }
  0x98   : > { %v320_v6 = vsel %vm283_vm0, %v316_v5, -inf }
  0x99   : > { %321 = vmax.xlane.f32.xlu0 %v320_v6 }
  0x9d   : > { %v313_v7 = vpop.f32.mrf.mxu0 }
  0x9e   : > { %v317_v8 = vmul.f32 0.35355338, %v313_v7 }
  0xa0   : > { %v323_v9 = vsel %vm283_vm0, %v317_v8, -inf }
  0xa1   : > { %324 = vmax.xlane.f32.xlu0 %v323_v9 }
 0x10c   : > { %v322_v13 = vpop.xlane.xlu0 %321 }
 0x10d   : > { %v326_v14 = vmax.f32 %v318_v12, %v322_v13 }
 0x10f   : > { %v328_v15 = vsub.f32 %v318_v12, %v326_v14  ;;  %405 = vst.msk [vmem:[#allocation2] sm:$0xff] %vm278_vm1, %v326_v14  ;;  %336 = vperm.xlu1 %602, %v326_v14  }
 0x111   : > { %v330_v16 = vmul.f32 1.442695, %v328_v15 }
 0x113   : > { %605 = vpow2.f32 %v330_v16 }
 0x114   : > { %v325_v18 = vpop.xlane.xlu0 %324 }
 0x115   : > { %v327_v19 = vmax.f32 %v319_v17, %v325_v18 }
 0x117   : > { %v329_v20 = vsub.f32 %v319_v17, %v327_v19  ;;  %406 = vst.msk [vmem:[#allocation2 + $0x8] sm:$0xff] %vm278_vm1, %v327_v19  ;;  %341 = vperm.xlu1 %602, %v327_v19  }
 0x119   : > { %v606_v21 = vpop.eup %605  ;;  %v332_v22 = vmul.f32 1.442695, %v329_v20 }
 0x11a   : > { %369 = vperm.xlu0 %603, %v606_v21   ;;  %v352_v38 = vmul.f32 %v606_v21, %v350_v37 }
 0x11b   : > { %607 = vpow2.f32 %v332_v22 }
 0x121   : > { %v608_v23 = vpop.eup %607 }
 0x122   : > { %374 = vperm.xlu1 %602, %v608_v23   ;;  %v353_v42 = vmul.f32 %v608_v23, %v351_v41 }
 0x181   : > { %v337_v26 = vpop.permute.xlu1 %336 }
 0x182   : > { %v344_v27 = vsub.f32 %v316_v5, %v337_v26 }
 0x184   : > { %v346_v28 = vmul.f32 1.442695, %v344_v27 }
 0x186   : > { %609 = vpow2.f32 %v346_v28 }
 0x189   : > { %v342_v29 = vpop.permute.xlu1 %341 }
 0x18a   : > { %v345_v30 = vsub.f32 %v317_v8, %v342_v29 }
 0x18c   : > { %v610_v31 = vpop.eup %609  ;;  %v348_v32 = vmul.f32 1.442695, %v345_v30  ;;  %v370_v47 = vpop.permute.xlu0 %369 }
 0x18d   : > { %v354_v33 = vsel %vm283_vm0, %v610_v31, 0.0  ;;  %v377_v49 = vmul.f32 %v370_v47, %v365_v46 }
 0x18e   : > { %611 = vpow2.f32 %v348_v32  ;;  %355 = vadd.xlane.f32.xlu2 %v354_v33 }
 0x194   : > { %v612_v34 = vpop.eup %611  ;;  %v375_v54 = vpop.permute.xlu1 %374 }
 0x195   : > { %v357_v35 = vsel %vm283_vm0, %v612_v34, 0.0  ;;  %v379_v36 = vpack.c.bf16 %v612_v34, %v610_v31  ;;  %v378_v56 = vmul.f32 %v375_v54, %v366_v53 }
 0x196   : > { %358 = vadd.xlane.f32.xlu2 %v357_v35 }
 0x197   : > { %569 = vmatmul.msk.bf16.vlgmr.msra.gmra.mxu1 %vm283_vm0, %v379_v36 }
 0x201   : > { %v356_v39 = vpop.xlane.xlu2 %355 }
 0x202   : > { %v360_v40 = vadd.f32 %v356_v39, %v352_v38 }
 0x204   : > { %363 = vst.msk [vmem:[#allocation3] sm:$0xff] %vm278_vm1, %v360_v40 }
 0x209   : > { %v359_v43 = vpop.xlane.xlu2 %358 }
 0x20a   : > { %v361_v44 = vadd.f32 %v359_v43, %v353_v42 }
 0x20b   : > { %v412_v45 = vld [vmem:[#allocation3] sm:$0xff] }
 0x20c   : > { %364 = vst.msk [vmem:[#allocation3 + $0x8] sm:$0xff] %vm278_vm1, %v361_v44  ;;  %613 = vrcp.f32 %v412_v45 }
 0x212   : > { %v614_v48 = vpop.eup %613 }
 0x213   : > { %418 = vperm.xlu2 %604, %v614_v48   ;;  %v413_v50 = vld [vmem:[#allocation3 + $0x8] sm:$0xff] }
 0x214   : > { %v396_v51 = vpop.f32.mrf.mxu1  ;;  %615 = vrcp.f32 %v413_v50 }
 0x215   : > { %v401_v52 = vadd.f32 %v396_v51, %v377_v49 }
 0x217   : > { %403 = vst.msk [vmem:[#allocation4] sm:$0xff] %vm283_vm0, %v401_v52 }
 0x21a   : > { %v616_v55 = vpop.eup %615 }
 0x21b   : > { %423 = vperm.xlu1 %602, %v616_v55  }
 0x21c   : > { %v398_v57 = vpop.f32.mrf.mxu1 }
 0x21d   : > { %v402_v58 = vadd.f32 %v398_v57, %v378_v56 }
 0x21e   : > { %v410_v60 = vld [vmem:[#allocation4] sm:$0xff] }
 0x21f   : > { %404 = vst.msk [vmem:[#allocation4 + $0x8] sm:$0xff] %vm283_vm0, %v402_v58 }
 0x226   : > { %v411_v63 = vld [vmem:[#allocation4 + $0x8] sm:$0xff] }
 0x26d   : > { %v419_v59 = vpop.permute.xlu2 %418 }
 0x26e   : > { %v426_v61 = vmul.f32 %v419_v59, %v410_v60 }
 0x270   : > { %v428_v62 = vpack.c.bf16 %v426_v61, %v426_v61 }
 0x272   : > { %431 = vst.msk [vmem:[%s271_s29] sm:$0xf] %vm430_vm3, %v428_v62 }
 0x28d   : > { %v424_v0 = vpop.permute.xlu1 %423 }
 0x28e   : > { %v427_v1 = vmul.f32 %v424_v0, %v411_v63 }
 0x290   : > { %v429_v2 = vpack.c.bf16 %v427_v1, %v427_v1 }
 0x292   : > { %432 = vst.msk [vmem:[%s271_s29 + $0x4] sm:$0xf] %vm430_vm3, %v429_v2 }
 0x293 PF: > { %s13_s14 = sadd.s32 1, %s639_s14   ;;  %s738_s12 = smov %s635_s13 }
 0x294   : > { %p10_p5 = scmp.ge.s32.totalorder %s13_s14, 10   ;;  %s739_s13 = smov %s741_s15 }
 0x296   :  { %12 = sbr.rel (!%p10_p5) target bundleno = 2 (0x2), region = 76 }

// kernel: ldm_cross_attn.9
= control target key start
LH: loop header
LB: loop body
LE: loop exit
PB: predicated region body
PF: predicated region fallthrough
CT: control target
= control target key end

     0   :  { %s199_s0 = inlined_call_operand.vmem [shape: bf16[32,32], index: 0, kind: input, shape index: {}]   ;;  %s200_s1 = inlined_call_operand.vmem [shape: bf16[32,32], index: 1, kind: input, shape index: {}]   ;;  %s201_s2 = inlined_call_operand.vmem [shape: f32[1,32], index: 2, kind: input, shape index: {}]   ;;  %s202_s3 = inlined_call_operand.hbm [shape: f32[32,32], index: 3, kind: output, shape index: {}]  }
   0x1   :  { %v119_v0 = vld [vmem:[%s200_s1 + $0x8] sm:$0xff]  ;;  %v118_v1 = vld [vmem:[%s200_s1] sm:$0xff] }
   0x2   :  { %63 = vmatpush.bf16.msra.mxu0 %v119_v0  ;;  %120 = vmatpush.bf16.msra.mxu1 %v119_v0 }
   0x3   :  { %8 = vsyncpa [#allocation3], 0  ;;  %v116_v2 = vld [vmem:[%s199_s0] sm:$0xff]  ;;  %v117_v3 = vld [vmem:[%s199_s0 + $0x8] sm:$0xff]  ;;  %vm50_vm0 = vcmask 261120   ;;  %s152_s0 = smov [#allocation2]  }
   0x4   :  { %v125_v4 = vld [vmem:[%s201_s2] ss:$0 sm:$0xff]  ;;  %s84_s1 = sshll.u32 %s152_s0, 4  ;;  %s86_s24 = sshll.u32 %s202_s3, 4  ;;  %s85_s1 = int_to_ptr.vmem [resolvable:$true] %s84_s1  ;;  %s87_s24 = int_to_ptr.hbm [resolvable:$true] %s86_s24 }
   0x5   :  { %s153_s2 = smov 128   ;;  %s154_s25 = smov 8  }
   0x6   :  { %64 = vmatpush.bf16.msra.mxu0 %v118_v1  ;;  %121 = vmatpush.bf16.msra.mxu1 %v118_v1 }
   0x9   :  { %114 = vmatmul.msk.bf16.vlgmr.msra.gmra.mxu0 %vm50_vm0, %v116_v2  ;;  %115 = vmatmul.msk.bf16.vlgmr.msra.gmra.mxu1 %vm50_vm0, %v117_v3 }
  0x86   :  { %v66_v5 = vpop.f32.mrf.mxu0  ;;  %v71_v6 = vpop.f32.mrf.mxu1 }
  0x87   :  { %v67_v7 = vadd.f32 %v125_v4, %v66_v5  ;;  %v72_v8 = vadd.f32 %v125_v4, %v71_v6 }
  0x89   :  { %76 = vst.msk [vmem:[#allocation2] sm:$0xff] %vm50_vm0, %v67_v7 }
  0x8a   :  { %78 = vst.msk [vmem:[#allocation2 + $0x10] sm:$0xff] %vm50_vm0, %v72_v8 }
  0x8e   :  { %v68_v9 = vpop.f32.mrf.mxu0  ;;  %v73_v10 = vpop.f32.mrf.mxu1 }
  0x8f   :  { %v69_v11 = vadd.f32 %v125_v4, %v68_v9  ;;  %v74_v12 = vadd.f32 %v125_v4, %v73_v10 }
  0x91   :  { %77 = vst.msk [vmem:[#allocation2 + $0x8] sm:$0xff] %vm50_vm0, %v69_v11 }
  0x92   :  { %79 = vst.msk [vmem:[#allocation2 + $0x18] sm:$0xff] %vm50_vm0, %v74_v12 }
  0x93   :  { %92 = dma.vmem_to_hbm [thread:$0]  %s85_s1, 512, %s87_s24, [#allocation3], %s153_s2, %s153_s2, %s154_s25  }
  0x94   :  { %150 = dma.done.wait [#allocation3], 512  }
  0x95   :  { %151 = vsyncadd [#allocation3], 4294966784 }
  0x96   :  { %97 = vsyncpa [#allocation3], 1 }

</bundles_post_ra>
